<compile_context>
chip_gen: v6e
topology: v6e:2x2x1
jax: 0.10.0
libtpu: 0.0.40
codegen_flags: <defaults>
</compile_context>

<pallas_src>
import functools

import jax
import jax.numpy as jnp
from jax.experimental import pallas as pl
from jax.experimental.pallas import tpu as pltpu

_LANES = 128
_SUBLANES = 8


def _qfocal_kernel(pred_ref, true_ref, acc_ref, *, gamma, alpha, total,
                   blk_rows, strip, masked, approx_recip):
    """One (blk_rows, 128) tile of quality-focal loss folded into an (8,128) accumulator."""
    inner_i = pl.program_id(1)  # inner (reduction) axis

    @pl.when(inner_i == 0)
    def _():
        acc_ref[...] = jnp.zeros_like(acc_ref)

    # Logical block index. For ragged grids the index_map clamps the DMA to the
    # last real block, but the mask below is computed from this *logical* index
    # so clamped / out-of-range / padded data contributes exactly zero.
    blk = pl.program_id(0) * pl.num_programs(1) + pl.program_id(1)
    num_strips = blk_rows // strip

    c1 = 2.0 * alpha - 1.0      # alpha_factor = z*c1 + c0 (constants folded)
    c0 = 1.0 - alpha

    if masked:
        # Element offset of each position inside a strip; hoisted out of the
        # loop (JAX does not CSE broadcast_in_dim inside loops).
        off = (jax.lax.broadcasted_iota(jnp.int32, (strip, _LANES), 0) * _LANES
               + jax.lax.broadcasted_iota(jnp.int32, (strip, _LANES), 1))

    def strip_body(s, acc):
        r0 = pl.multiple_of(s * strip, strip)
        x = pred_ref[pl.ds(r0, strip), :].astype(jnp.float32)   # logits
        z = true_ref[pl.ds(r0, strip), :].astype(jnp.float32)   # targets

        # Numerically stable BCE-with-logits, sharing e = exp(-|x|) with sigmoid:
        #   bce     = max(x,0) - x*z + log1p(e)
        #   sigmoid = where(x>=0, 1, e) / (1 + e)
        e = jnp.exp(-jnp.abs(x))
        bce = jnp.maximum(x, 0.0) - x * z + jnp.log1p(e)
        num = jnp.where(x >= 0.0, 1.0, e)
        if approx_recip:
            p = num * pl.reciprocal(1.0 + e, approx=True)   # EUP recip, ~2^-12 rel err
        else:
            p = num / (1.0 + e)

        af = z * c1 + c0
        t = jnp.abs(z - p)
        if gamma == 1.5:
            mf = t * jnp.sqrt(t)          # t**1.5 without the exp/log pair (0 -> 0)
        elif float(gamma) == int(gamma):
            mf = t ** int(gamma)          # integer powers lower to multiplies
        else:
            mf = t ** gamma

        loss = bce * af * mf              # (strip, 128)

        if masked:
            # Zero out lane-padded tail, partial-block garbage and clamped blocks.
            # NOTE: int32 element indices -> assumes total < 2**31 elements.
            base = (blk * blk_rows + s * strip) * _LANES
            loss = jnp.where(base + off < total, loss, 0.0)

        # Fold the strip down to one (8,128) vreg using pure VPU adds.
        return acc + loss.reshape(strip // _SUBLANES, _SUBLANES, _LANES).sum(axis=0)

    part = jax.lax.fori_loop(0, num_strips, strip_body,
                             jnp.zeros((_SUBLANES, _LANES), jnp.float32))
    acc_ref[...] += part


def _device_kind() -> str:
    try:
        return jax.devices()[0].device_kind.lower()
    except Exception:
        return ""


def qfocal_loss(pred, true, gamma=1.5, alpha=0.25, *, reduction="mean",
                block_rows=None, num_slices=None, approx_recip=True):
    """pred, true: same-shape arrays (any layout/dtype). Returns scalar loss."""
    assert pred.shape == true.shape
    total = int(pred.size)
    assert total > 0

    kind = _device_kind()
    if block_rows is None:
        # 8192x128 f32 = 4 MiB/buffer -> 16 MiB double-buffered for both inputs
        # (fits v6e/v7x comfortably with the explicit vmem limit below);
        # v5e's scoped-VMEM default is tighter, so use 4096 there.
        block_rows = 4096 if "v5" in kind else 8192
    if num_slices is None:
        # v7x has 2 TensorCores/chip and this kernel is VALU-bound per TC there;
        # single-TC v5e/v6e gain nothing from the extra split.
        num_slices = 2 if "v7" in kind else 1

    p = jnp.ravel(pred)
    t = jnp.ravel(true)

    rows = -(-total // _LANES)
    pad = rows * _LANES - total
    if pad:
        # Only for size % 128 != 0; the in-kernel mask zeroes these elements.
        # TODO(synk): a 1-D BlockSpec over the raw raveled array would avoid this copy.
        p = jnp.concatenate([p, jnp.zeros((pad,), p.dtype)])
        t = jnp.concatenate([t, jnp.zeros((pad,), t.dtype)])
    p2d = p.reshape(rows, _LANES)
    t2d = t.reshape(rows, _LANES)

    # Tile rows: multiple of 16 sublanes (valid for f32 and packed bf16/fp16).
    br = min(block_rows, rows)
    br = -(-br // 16) * 16
    strip = 32 if br % 32 == 0 else 16

    nblocks = -(-rows // br)
    num_slices = max(1, min(num_slices, nblocks))
    inner = -(-nblocks // num_slices)

    # Mask only when something is ragged: lane-padded tail, partial last block,
    # or a duplicated (clamped) block because nblocks doesn't split evenly.
    needs_mask = (pad != 0) or (rows % br != 0) or (nblocks != num_slices * inner)

    if nblocks == num_slices * inner:
        def in_map(c, i):
            return (c * inner + i, 0)
    else:
        last_block = nblocks - 1

        def in_map(c, i):
            # Clamp the DMA to the last real block; the logical-index mask in the
            # kernel zeroes the duplicated contribution.
            return (jnp.minimum(c * inner + i, last_block), 0)

    kernel = functools.partial(
        _qfocal_kernel, gamma=gamma, alpha=alpha, total=total,
        blk_rows=br, strip=strip, masked=needs_mask, approx_recip=approx_recip)

    in_bytes = p2d.size * p2d.dtype.itemsize + t2d.size * t2d.dtype.itemsize
    buf_bytes = 2 * br * _LANES * (p2d.dtype.itemsize + t2d.dtype.itemsize)
    vmem_limit = int(min(max(32 << 20, buf_bytes + (8 << 20)), 48 << 20))

    partials = pl.pallas_call(
        kernel,
        out_shape=jax.ShapeDtypeStruct((num_slices, _SUBLANES, _LANES), jnp.float32),
        grid_spec=pltpu.PrefetchScalarGridSpec(
            num_scalar_prefetch=0,
            grid=(num_slices, inner),
            in_specs=[
                pl.BlockSpec((br, _LANES), in_map),
                pl.BlockSpec((br, _LANES), in_map),
            ],
            # Per-slice (8,128) accumulator block stays resident across the
            # inner ("arbitrary") axis; one block per outer ("parallel") slice.
            out_specs=pl.BlockSpec((None, _SUBLANES, _LANES), lambda c, i: (c, 0, 0)),
        ),
        compiler_params=pltpu.CompilerParams(
            dimension_semantics=("parallel", "arbitrary"),
            vmem_limit_bytes=vmem_limit,
        ),
        cost_estimate=pl.CostEstimate(
            flops=17 * total,
            transcendentals=4 * total,
            bytes_accessed=in_bytes + num_slices * _SUBLANES * _LANES * 4,
        ),
    )(p2d, t2d)

    s = jnp.sum(partials)   # tiny (num_slices*8*128) reduction + divide in XLA
    if reduction == "mean":
        return s / total
    elif reduction == "sum":
        return s
    else:
        # TODO(synk): reduction='none' (per-element output) not implemented in this kernel wrapper.
        raise NotImplementedError("reduction='none' not supported by this kernel wrapper")


def qfocal_loss_ref(pred, true, gamma=1.5, alpha=0.25):
    x = pred.astype(jnp.float32)
    z = true.astype(jnp.float32)
    bce = jnp.maximum(x, 0.0) - x * z + jnp.log1p(jnp.exp(-jnp.abs(x)))
    p = jax.nn.sigmoid(x)
    af = z * alpha + (1.0 - z) * (1.0 - alpha)
    mf = jnp.abs(z - p) ** gamma
    return jnp.mean(bce * af * mf)


if __name__ == "__main__":
    key = jax.random.PRNGKey(0)
    k1, k2 = jax.random.split(key)

    # NCHW, as the PyTorch module would receive: batch=2, channels=4, spatial=16x16.
    pred = jax.random.normal(k1, (2, 4, 16, 16), dtype=jnp.float32)
    true = (jax.random.uniform(k2, (2, 4, 16, 16)) > 0.5).astype(jnp.float32)

    out = qfocal_loss(pred, true)
    out = jax.block_until_ready(out)

    ref = qfocal_loss_ref(pred, true)
    # pl.reciprocal(approx=True) perturbs sigmoid by ~2^-12 relative -> loosen rtol.
    assert jnp.allclose(out, ref, rtol=1e-3, atol=1e-6), (out, ref)

    print("KERNEL_OK")
</pallas_src>

<mosaic_0001>
module attributes {stable_mosaic.version = 11 : i64} {
  func.func @_qfocal_kernel(%arg0: i32, %arg1: i32, %arg2: memref<16x128xf32, #tpu.memory_space<vmem>>, %arg3: memref<16x128xf32, #tpu.memory_space<vmem>>, %arg4: memref<1x8x128xf32, #tpu.memory_space<vmem>>) attributes {dimension_semantics = [#tpu.dimension_semantics<parallel>, #tpu.dimension_semantics<arbitrary>], iteration_bounds = array<i64: 1, 1>, scalar_prefetch = 0 : i64, scratch_operands = 0 : i64, tpu.core_type = #tpu.core_type<tc>, window_params = [{transform_indices = @transform_0, window_bounds = array<i64: 16, 128>}, {transform_indices = @transform_1, window_bounds = array<i64: 16, 128>}, {transform_indices = @transform_2, window_bounds = array<i64: 1, 8, 128>}]} {
    %c0_i32 = arith.constant 0 : i32
    %0 = arith.cmpi eq, %arg1, %c0_i32 : i32
    %1 = arith.extui %0 : i1 to i32
    %c0_i32_0 = arith.constant 0 : i32
    %2 = arith.cmpi ne, %1, %c0_i32_0 : i32
    scf.if %2 {
      %cst_17 = arith.constant 0.000000e+00 : f32
      %47 = vector.broadcast %cst_17 : f32 to vector<8x128xf32>
      %c0_18 = arith.constant 0 : index
      %c0_19 = arith.constant 0 : index
      %c0_20 = arith.constant 0 : index
      %48 = vector.load %arg4[%c0_18, %c0_19, %c0_20] : memref<1x8x128xf32, #tpu.memory_space<vmem>>, vector<1x8x128xf32>
      %49 = vector.shape_cast %48 : vector<1x8x128xf32> to vector<8x128xf32>
      %50 = vector.shape_cast %47 : vector<8x128xf32> to vector<1x8x128xf32>
      tpu.vector_store %arg4[%c0_18, %c0_19, %c0_20], %50 {strides = array<i32>} : memref<1x8x128xf32, #tpu.memory_space<vmem>>, vector<1x8x128xf32>,
    } else {
    }
    %cst = arith.constant 0.000000e+00 : f32
    %3 = vector.broadcast %cst : f32 to vector<8x128xf32>
    %c0_i32_1 = arith.constant 0 : i32
    %c16_i32 = arith.constant 16 : i32
    %4 = arith.muli %c0_i32_1, %c16_i32 : i32
    %5 = tpu.assume_multiple %4, 16 : i32
    %6 = arith.index_cast %5 : i32 to index
    %c0 = arith.constant 0 : index
    %7 = vector.load %arg2[%6, %c0] : memref<16x128xf32, #tpu.memory_space<vmem>>, vector<16x128xf32>
    %8 = arith.index_cast %5 : i32 to index
    %c0_2 = arith.constant 0 : index
    %9 = vector.load %arg3[%8, %c0_2] : memref<16x128xf32, #tpu.memory_space<vmem>>, vector<16x128xf32>
    %10 = math.absf %7 : vector<16x128xf32>
    %cst_3 = arith.constant 0.000000e+00 : f32
    %11 = vector.broadcast %cst_3 : f32 to vector<16x128xf32>
    %12 = arith.subf %11, %10 : vector<16x128xf32>
    %13 = math.exp %12 : vector<16x128xf32>
    %cst_4 = arith.constant 0.000000e+00 : f32
    %14 = vector.broadcast %cst_4 : f32 to vector<16x128xf32>
    %15 = arith.maximumf %7, %14 : vector<16x128xf32>
    %16 = arith.mulf %7, %9 : vector<16x128xf32>
    %17 = arith.subf %15, %16 : vector<16x128xf32>
    %18 = math.log1p %13 : vector<16x128xf32>
    %19 = arith.addf %17, %18 : vector<16x128xf32>
    %cst_5 = arith.constant 0.000000e+00 : f32
    %20 = vector.broadcast %cst_5 : f32 to vector<16x128xf32>
    %21 = arith.cmpf oge, %7, %20 : vector<16x128xf32>
    %cst_6 = arith.constant 1.000000e+00 : f32
    %22 = vector.broadcast %cst_6 : f32 to vector<16x128xf32>
    %23 = arith.select %21, %22, %13 : vector<16x128xi1>, vector<16x128xf32>
    %cst_7 = arith.constant 1.000000e+00 : f32
    %24 = vector.broadcast %cst_7 : f32 to vector<16x128xf32>
    %25 = arith.addf %24, %13 : vector<16x128xf32>
    %26 = tpu.reciprocal %25 {approx = true} : vector<16x128xf32> -> vector<16x128xf32>
    %27 = arith.mulf %23, %26 : vector<16x128xf32>
    %cst_8 = arith.constant -5.000000e-01 : f32
    %28 = vector.broadcast %cst_8 : f32 to vector<16x128xf32>
    %29 = arith.mulf %9, %28 : vector<16x128xf32>
    %cst_9 = arith.constant 7.500000e-01 : f32
    %30 = vector.broadcast %cst_9 : f32 to vector<16x128xf32>
    %31 = arith.addf %29, %30 : vector<16x128xf32>
    %32 = arith.subf %9, %27 : vector<16x128xf32>
    %33 = math.absf %32 : vector<16x128xf32>
    %34 = math.sqrt %33 : vector<16x128xf32>
    %35 = arith.mulf %33, %34 : vector<16x128xf32>
    %36 = arith.mulf %19, %31 : vector<16x128xf32>
    %37 = arith.mulf %36, %35 : vector<16x128xf32>
    %38 = vector.shape_cast %37 : vector<16x128xf32> to vector<2x8x128xf32>
    %cst_10 = arith.constant dense<0.000000e+00> : vector<8x128xf32>
    %39 = vector.multi_reduction <add>, %38, %cst_10 [0] : vector<2x8x128xf32> to vector<8x128xf32>
    %40 = arith.addf %3, %39 : vector<8x128xf32>
    %c1_i32 = arith.constant 1 : i32
    %c0_11 = arith.constant 0 : index
    %c0_12 = arith.constant 0 : index
    %c0_13 = arith.constant 0 : index
    %41 = vector.load %arg4[%c0_11, %c0_12, %c0_13] : memref<1x8x128xf32, #tpu.memory_space<vmem>>, vector<1x8x128xf32>
    %42 = vector.shape_cast %41 : vector<1x8x128xf32> to vector<8x128xf32>
    %43 = arith.addf %42, %40 : vector<8x128xf32>
    %c0_14 = arith.constant 0 : index
    %c0_15 = arith.constant 0 : index
    %c0_16 = arith.constant 0 : index
    %44 = vector.load %arg4[%c0_14, %c0_15, %c0_16] : memref<1x8x128xf32, #tpu.memory_space<vmem>>, vector<1x8x128xf32>
    %45 = vector.shape_cast %44 : vector<1x8x128xf32> to vector<8x128xf32>
    %46 = vector.shape_cast %43 : vector<8x128xf32> to vector<1x8x128xf32>
    tpu.vector_store %arg4[%c0_14, %c0_15, %c0_16], %46 {strides = array<i32>} : memref<1x8x128xf32, #tpu.memory_space<vmem>>, vector<1x8x128xf32>,
    return
  }
  func.func @transform_0(%arg0: i32, %arg1: i32) -> (i32, i32) {
    %c1_i32 = arith.constant 1 : i32
    %0 = arith.muli %arg0, %c1_i32 : i32
    %1 = arith.addi %0, %arg1 : i32
    %c0_i32 = arith.constant 0 : i32
    %c0_i32_0 = arith.constant 0 : i32
    return %1, %c0_i32 : i32, i32
  }
  func.func @transform_1(%arg0: i32, %arg1: i32) -> (i32, i32) {
    %c1_i32 = arith.constant 1 : i32
    %0 = arith.muli %arg0, %c1_i32 : i32
    %1 = arith.addi %0, %arg1 : i32
    %c0_i32 = arith.constant 0 : i32
    %c0_i32_0 = arith.constant 0 : i32
    return %1, %c0_i32 : i32, i32
  }
  func.func @transform_2(%arg0: i32, %arg1: i32) -> (i32, i32, i32) {
    %c0_i32 = arith.constant 0 : i32
    %c0_i32_0 = arith.constant 0 : i32
    %c0_i32_1 = arith.constant 0 : i32
    return %arg0, %c0_i32, %c0_i32_0 : i32, i32, i32
  }
}

</mosaic_0001>

<bundles_post_ra>
// kernel: tpu_custom_call.1
= control target key start
LH: loop header
LB: loop body
LE: loop exit
PB: predicated region body
PF: predicated region fallthrough
CT: control target
= control target key end

     0   :  { %7 = vsyncpa [#allocation3], 0  ;;  %s271_s0 = inlined_call_operand.hbm [shape: f32[16,128], index: 0, kind: input, shape index: {}]   ;;  %s272_s1 = inlined_call_operand.hbm [shape: f32[16,128], index: 1, kind: input, shape index: {}]   ;;  %s273_s2 = inlined_call_operand.hbm [shape: f32[1,8,128], index: 2, kind: output, shape index: {}]  }
   0x1   :  { %8 = vsyncpa [#allocation6], 0 }
   0x2   :  { %9 = vsyncpa [#allocation4], 0  ;;  %s242_s9 = smov [#allocation2]  }
   0x3   :  { %s19_s10 = sshll.u32 %s242_s9, 4  ;;  %s20_s10 = int_to_ptr.vmem [resolvable:$true] %s19_s10 }
   0x4   :  { %s184_s11 = scalar_lea.vmem %s20_s10, 256  ;;  %p189_p1 = scmp.lt.s32.totalorder %s20_s10, %s20_s10 }
   0x5   :  { %p185_p0 = scmp.ne.s32.totalorder %s20_s10, %s184_s11  ;;  %p190_p2 = scmp.lt.s32.totalorder %s184_s11, %s184_s11 }
   0x7   :  { %p191_p3 = por %p190_p2, %p189_p1 }
   0x9   :  { %p192_p4 = pnand %p191_p3, %p185_p0 }
   0xb   :  { %195 = shalt.err (!%p192_p4)
}
   0xc   :  { %s243_s12 = smov 128   ;;  %s244_s13 = smov 8  }
   0xd   :  { %25 = dma.hbm_to_vmem [thread:$0]  %s271_s0, 256, %s20_s10, [#allocation3], %s243_s12, %s243_s12, %s244_s13  }
   0xe   :  { %s245_s16 = smov [#allocation5]  }
   0xf   :  { %s35_s17 = sshll.u32 %s245_s16, 4  ;;  %s36_s17 = int_to_ptr.vmem [resolvable:$true] %s35_s17 }
  0x10   :  { %s204_s18 = scalar_lea.vmem %s36_s17, 256  ;;  %p209_p6 = scmp.lt.s32.totalorder %s36_s17, %s36_s17 }
  0x11   :  { %p205_p5 = scmp.ne.s32.totalorder %s36_s17, %s204_s18  ;;  %p210_p7 = scmp.lt.s32.totalorder %s204_s18, %s204_s18 }
  0x13   :  { %p211_p8 = por %p210_p7, %p209_p6 }
  0x15   :  { %p212_p9 = pnand %p211_p8, %p205_p5 }
  0x17   :  { %215 = shalt.err (!%p212_p9)
}
  0x18   :  { %41 = dma.hbm_to_vmem [thread:$0]  %s272_s1, 256, %s36_s17, [#allocation6], %s243_s12, %s243_s12, %s244_s13  }
  0x19   :  { %236 = dma.done.wait [#allocation3], 256  }
  0x1a   :  { %237 = vsyncadd [#allocation3], 4294967040 }
  0x1b   :  { %238 = dma.done.wait [#allocation6], 256  }
  0x1c   :  { %239 = vsyncadd [#allocation6], 4294967040  ;;  %v57_v0 = vld [vmem:[#allocation2] sm:$0xff]  ;;  %v58_v1 = vld [vmem:[#allocation2 + $0x8] sm:$0xff]  ;;  %s246_s0 = smov [#allocation7]  }
  0x1d   :  { %v61_v2 = vand.u32 2147483647, %v57_v0  ;;  %v62_v3 = vand.u32 2147483647, %v58_v1  ;;  %vm95_vm0 = vcmp.ge.f32.partialorder %v57_v0, 0.0  ;;  %vm96_vm1 = vcmp.ge.f32.partialorder %v58_v1, 0.0 }
  0x1e   :  { %v59_v15 = vld [vmem:[#allocation5] sm:$0xff]  ;;  %v60_v17 = vld [vmem:[#allocation5 + $0x8] sm:$0xff]  ;;  %v69_v32 = vmax.f32 %v57_v0, 0.0  ;;  %v70_v34 = vmax.f32 %v58_v1, 0.0  ;;  %s144_s1 = sshll.u32 %s246_s0, 4  ;;  %s145_s1 = int_to_ptr.vmem [resolvable:$true] %s144_s1 }
  0x1f   :  { %v63_v4 = vsub.f32 0.0, %v61_v2  ;;  %v64_v5 = vsub.f32 0.0, %v62_v3  ;;  %v71_v33 = vmul.f32 %v59_v15, %v57_v0  ;;  %v72_v35 = vmul.f32 %v60_v17, %v58_v1  ;;  %s216_s21 = scalar_lea.vmem %s145_s1, 128  ;;  %p221_p11 = scmp.lt.s32.totalorder %s145_s1, %s145_s1 }
  0x20   :  { %v105_v41 = vmul.f32 -0.5, %v59_v15  ;;  %v106_v44 = vmul.f32 -0.5, %v60_v17  ;;  %p217_p10 = scmp.ne.s32.totalorder %s145_s1, %s216_s21  ;;  %p222_p12 = scmp.lt.s32.totalorder %s216_s21, %s216_s21 }
  0x21   :  { %v65_v6 = vmul.f32 1.442695, %v63_v4  ;;  %v67_v7 = vmul.f32 1.442695, %v64_v5  ;;  %v73_v40 = vsub.f32 %v69_v32, %v71_v33  ;;  %v74_v42 = vsub.f32 %v70_v34, %v72_v35 }
  0x22   :  { %v107_v47 = vadd.f32 0.75, %v105_v41  ;;  %v108_v50 = vadd.f32 0.75, %v106_v44  ;;  %p223_p13 = por %p222_p12, %p221_p11 }
  0x23   :  { %160 = vpow2.f32 %v65_v6 }
  0x24   :  { %162 = vpow2.f32 %v67_v7  ;;  %p224_p0 = pnand %p223_p13, %p217_p10 }
  0x30   :  { %v161_v8 = vpop.eup %160 }
  0x31   :  { %v163_v9 = vpop.eup %162  ;;  %v75_v10 = vadd.f32 1.0, %v161_v8  ;;  %v97_v12 = vsel %vm95_vm0, 1.0, %v161_v8  ;;  %v78_v21 = vmul.f32 -0.5, %v161_v8  ;;  %v81_v28 = vand.u32 2147483647, %v161_v8 }
  0x32   :  { %v84_v11 = vadd.f32 1.0, %v163_v9  ;;  %v98_v13 = vsel %vm96_vm1, 1.0, %v163_v9  ;;  %v87_v23 = vmul.f32 -0.5, %v163_v9  ;;  %v90_v31 = vand.u32 2147483647, %v163_v9 }
  0x33   :  { %164 = vrcp.f32 %v75_v10  ;;  %v79_v26 = vadd.f32 1.0, %v78_v21  ;;  %vm82_vm2 = vcmp.lt.f32.partialorder %v81_v28, 0.0004427343 }
  0x34   :  { %166 = vrcp.f32 %v84_v11  ;;  %v88_v29 = vadd.f32 1.0, %v87_v23  ;;  %vm91_vm3 = vcmp.lt.f32.partialorder %v90_v31, 0.0004427343 }
  0x35   :  { %168 = vlog2.f32 %v75_v10  ;;  %v80_v37 = vmul.f32 %v161_v8, %v79_v26 }
  0x36   :  { %170 = vlog2.f32 %v84_v11  ;;  %v89_v39 = vmul.f32 %v163_v9, %v88_v29 }
  0x40   :  { %v165_v14 = vpop.eup %164 }
  0x41   :  { %v167_v16 = vpop.eup %166  ;;  %v103_v18 = vmul.f32 %v165_v14, %v97_v12 }
  0x42   :  { %v104_v19 = vmul.f32 %v167_v16, %v98_v13  ;;  %v169_v27 = vpop.eup %168 }
  0x43   :  { %v109_v20 = vsub.f32 %v59_v15, %v103_v18  ;;  %v171_v30 = vpop.eup %170  ;;  %v77_v36 = vmul.f32 0.6931472, %v169_v27 }
  0x44   :  { %v110_v22 = vsub.f32 %v60_v17, %v104_v19  ;;  %v86_v38 = vmul.f32 0.6931472, %v171_v30 }
  0x45   :  { %v111_v24 = vand.u32 2147483647, %v109_v20  ;;  %v83_v43 = vsel %vm82_vm2, %v80_v37, %v77_v36 }
  0x46   :  { %v112_v25 = vand.u32 2147483647, %v110_v22  ;;  %v92_v45 = vsel %vm91_vm3, %v89_v39, %v86_v38  ;;  %v93_v46 = vadd.f32 %v83_v43, %v73_v40 }
  0x47   :  { %172 = vrsqrt.f32 %v111_v24  ;;  %v94_v49 = vadd.f32 %v92_v45, %v74_v42  ;;  %vm115_vm4 = vcmp.eq.f32.partialorder %v111_v24, inf  ;;  %v118_v51 = vand.u32 2147483648, %v111_v24 }
  0x48   :  { %174 = vrsqrt.f32 %v112_v25  ;;  %vm117_vm5 = vcmp.eq.f32.partialorder %v111_v24, 0.0  ;;  %vm122_vm6 = vcmp.eq.f32.partialorder %v112_v25, inf  ;;  %v125_v54 = vand.u32 2147483648, %v112_v25 }
  0x49   :  { %vm124_vm7 = vcmp.eq.f32.partialorder %v112_v25, 0.0  ;;  %v129_v57 = vmul.f32 %v107_v47, %v93_v46  ;;  %v130_v60 = vmul.f32 %v108_v50, %v94_v49 }
  0x54   :  { %v173_v48 = vpop.eup %172 }
  0x55   :  { %v175_v52 = vpop.eup %174  ;;  %v114_v53 = vmul.f32 %v173_v48, %v111_v24 }
  0x56   :  { %v121_v55 = vmul.f32 %v175_v52, %v112_v25 }
  0x57   :  { %v116_v56 = vsel %vm115_vm4, %v111_v24, %v114_v53 }
  0x58   :  { %v119_v58 = vsel %vm117_vm5, %v118_v51, %v116_v56  ;;  %v123_v59 = vsel %vm122_vm6, %v112_v25, %v121_v55 }
  0x59   :  { %v126_v61 = vsel %vm124_vm7, %v125_v54, %v123_v59  ;;  %v127_v62 = vmul.f32 %v119_v58, %v111_v24 }
  0x5a   :  { %v128_v63 = vmul.f32 %v126_v61, %v112_v25 }
  0x5b   :  { %v131_v0 = vmul.f32 %v129_v57, %v127_v62 }
  0x5c   :  { %v132_v1 = vmul.f32 %v130_v60, %v128_v63 }
  0x5e   :  { %v133_v2 = vadd.f32 %v132_v1, %v131_v0 }
  0x60   :  { %137 = vst [vmem:[#allocation7] sm:$0xff] %v133_v2 }
  0x61   :  { %227 = shalt.err (!%p224_p0)
}
  0x62   :  { %147 = dma.vmem_to_hbm [thread:$0]  %s145_s1, 128, %s273_s2, [#allocation4]  }
  0x63   :  { %240 = dma.done.wait [#allocation4], 128  }
  0x64   :  { %241 = vsyncadd [#allocation4], 4294967168 }
  0x65   :  { %151 = vsyncpa [#allocation3], 1 }
  0x66   :  { %152 = vsyncpa [#allocation6], 1 }
  0x67   :  { %153 = vsyncpa [#allocation4], 1 }

</bundles_post_ra>
